<compile_context>
chip_gen: v7x
topology: tpu7x:2x2x1
jax: 0.10.0
libtpu: 0.0.40
codegen_flags: <defaults>
</compile_context>

<pallas_src>
import functools

import jax
import jax.numpy as jnp
from jax.experimental import pallas as pl
from jax.experimental.pallas import tpu as pltpu


_DEFAULT_TILE_N = 65536
_VMEM_WORKSET_BUDGET = 40 << 20   # double-buffered input working-set budget
_MIN_VMEM_LIMIT = 16 << 20
_MAX_VMEM_LIMIT = 48 << 20        # stays well inside v7x's 64 MiB physical VMEM


def _round_up(x, m):
    return ((x + m - 1) // m) * m


def _default_num_splits():
    """2 on chips exposing 2 TensorCores (v7x); 1 on single-TC v5e/v6e."""
    try:
        dev = jax.devices()[0]
        n_cores = getattr(dev, "num_cores", None) or getattr(dev, "core_count", None)
        if n_cores:
            return max(1, int(n_cores))
        if "v7" in str(getattr(dev, "device_kind", "")).lower():
            return 2
    except Exception:
        pass
    return 1


def _pow_static(x, gamma):
    """x**gamma with a static float gamma.

    Integer gammas (the common case, gamma=2) lower to VALU multiplies instead
    of exp(gamma*log(x)) on the EUP (also avoids log(0) hazards).
    """
    g = float(gamma)
    if g == 0.0:
        return jnp.ones_like(x)
    if g > 0 and g == int(g) and int(g) <= 8:
        k = int(g)
        acc = None
        base = x
        while k:
            if k & 1:
                acc = base if acc is None else acc * base
            k >>= 1
            if k:
                base = base * base
        return acc
    return jnp.power(x, g)


def _focal_loss_kernel(pred_ref, tgt_ref, out_ref, acc_loss_ref, acc_cnt_ref, *,
                       gamma, alpha, ignore_index, n_rows, steps_per_split):
    s = pl.program_id(0)   # split index ("parallel" -> one per TensorCore on v7x)
    i = pl.program_id(1)   # row-tile step within this split ("arbitrary" reduction)

    @pl.when(i == 0)
    def _():
        acc_loss_ref[...] = jnp.zeros_like(acc_loss_ref)
        acc_cnt_ref[...] = jnp.zeros_like(acc_cnt_ref)

    x = pred_ref[...].astype(jnp.float32)      # (C, TN) logits, rows on lanes
    tgt = tgt_ref[...]                         # (1, TN) int32 class ids
    c, tn = x.shape

    # Global row ids use the *unclamped* linear step index, so clamped duplicate
    # blocks and the ragged tail block are fully masked out (and not counted).
    row0 = (s * steps_per_split + i) * tn
    row = row0 + jax.lax.broadcasted_iota(jnp.int32, (1, tn), 1)
    valid_row = jnp.logical_and(row < n_rows, tgt != ignore_index)    # (1, TN)

    # sign = 1-2*onehot and alpha_w = alpha*onehot + (1-alpha)*(1-onehot) taken
    # straight from the predicate; no float one-hot is materialized.
    is_pos = jax.lax.broadcasted_iota(jnp.int32, (c, tn), 0) == tgt   # (C, TN)
    sign = jnp.where(is_pos, -1.0, 1.0)
    alpha_w = jnp.where(is_pos, alpha, 1.0 - alpha)

    # Fused sigmoid + BCE-with-logits via z = x*sign:
    #   one_minus_pt = (1-p)*t + p*(1-t) = sigmoid(z)
    #   bce_with_logits(x, t)            = softplus(z)
    z = x * sign
    e = jnp.exp(-jnp.abs(z))                                   # single EUP exp
    inv = pl.reciprocal(1.0 + e, approx=True)                  # EUP vrcp, spare slot
    one_minus_pt = jnp.where(z >= 0, 1.0, e) * inv             # stable sigmoid(z)
    bce = jnp.maximum(z, 0.0) + jnp.log1p(e)                   # stable softplus(z)

    loss = jnp.where(valid_row,
                     bce * alpha_w * _pow_static(one_minus_pt, gamma), 0.0)

    # Reduce the tile to scalars and fold into tiny fixed-size accumulators.
    # Masked lanes were zeroed by the select above, so NaN/Inf garbage from the
    # padded tail cannot reach the accumulators.
    acc_loss_ref[...] += jnp.sum(loss)
    acc_cnt_ref[...] += jnp.sum(valid_row.astype(jnp.float32))

    # Store once per split (the output block is resident across the i axis).
    @pl.when(i == pl.num_programs(1) - 1)
    def _():
        out_ref[0, 0:1, :] = acc_loss_ref[...]
        out_ref[0, 1:2, :] = acc_cnt_ref[...]


def focal_loss(pred, target, *, gamma=2.0, alpha=0.5, reduction='mean',
               loss_weight=1.0, ignore_index=-1, tile_n=_DEFAULT_TILE_N,
               num_splits=None, pred_transposed=False):
    """Pallas TPU FocalLoss forward.

    Args:
      pred: (N, C) float logits, or (B, C, *spatial) which is flattened like the
        torch module.  If `pred_transposed=True`, pred must already be (C, N) —
        this skips the wrapper-side HBM transpose (preferred: produce (C, N)
        upstream, e.g. by transposing the final matmul).
      target: int class indices, reshaped to (N,); ignore_index rows are skipped.
    Returns:
      scalar float32 loss (mean reduction).
    """
    assert reduction in ('mean', 'sum')
    # TODO(synk): torch code's 'sum' branch calls .total(), which does not exist; only 'mean' implemented.
    assert reduction == 'mean', "only 'mean' reduction supported"
    # TODO(synk): list-typed per-class alpha not supported (float only).
    assert isinstance(alpha, float), "alpha must be a float"

    if pred_transposed:
        assert pred.ndim == 2, "pred_transposed=True expects a (C, N) array"
        pred_cn = pred
        c, n = pred.shape
    elif pred.ndim == 2:
        n, c = pred.shape
        pred_cn = jnp.transpose(pred)            # (C, N); costs one extra HBM pass
    else:
        # (B, C, *spatial) -> (C, B*spatial), matching the torch reshape chain.
        c = pred.shape[1]
        pred_cn = jnp.swapaxes(pred, 0, 1).reshape(c, -1)
        n = pred_cn.shape[1]

    target = target.reshape(-1)
    assert target.shape[0] == n, "The shape of pred doesn't match the shape of target"
    if n == 0:
        return jnp.float32(0.0)

    target2d = target.reshape(1, -1).astype(jnp.int32)

    # ---- tile sizing: large lane tiles under an explicit VMEM budget ----
    pred_bytes = jnp.dtype(pred_cn.dtype).itemsize
    tile = max(128, min(int(tile_n), _round_up(n, 128)))
    tile = _round_up(tile, 128)

    def _workset(t):   # double-buffered pred + target input blocks
        return 2 * (c * t * pred_bytes + t * 4)

    while tile > 1024 and _workset(tile) > _VMEM_WORKSET_BUDGET:
        tile = _round_up(tile // 2, 128)
    vmem_limit = int(min(max(_workset(tile) + (4 << 20), _MIN_VMEM_LIMIT),
                         _MAX_VMEM_LIMIT))

    n_blocks = int(pl.cdiv(n, tile))
    if num_splits is None:
        num_splits = _default_num_splits()
    num_splits_eff = int(max(1, min(int(num_splits), n_blocks)))
    steps_per_split = int(pl.cdiv(n_blocks, num_splits_eff))
    max_blk = n_blocks - 1

    kernel = functools.partial(
        _focal_loss_kernel, gamma=float(gamma), alpha=float(alpha),
        ignore_index=int(ignore_index), n_rows=int(n),
        steps_per_split=steps_per_split)

    def data_map(s_idx, i_idx):
        # Clamp so block indices never run past the array; clamped duplicate
        # blocks are fully masked (and not counted) in-kernel.
        blk = jnp.minimum(s_idx * steps_per_split + i_idx, max_blk)
        return (0, blk)

    sums = pl.pallas_call(
        kernel,
        out_shape=jax.ShapeDtypeStruct((num_splits_eff, 2, 128), jnp.float32),
        grid_spec=pltpu.PrefetchScalarGridSpec(
            num_scalar_prefetch=0,
            grid=(num_splits_eff, steps_per_split),
            in_specs=[
                pl.BlockSpec((c, tile), data_map),
                pl.BlockSpec((1, tile), data_map),
            ],
            out_specs=pl.BlockSpec((1, 2, 128), lambda s_idx, i_idx: (s_idx, 0, 0)),
            scratch_shapes=[pltpu.VMEM((1, 128), jnp.float32),   # loss-sum acc
                            pltpu.VMEM((1, 128), jnp.float32)],  # valid-count acc
        ),
        compiler_params=pltpu.CompilerParams(
            dimension_semantics=("parallel", "arbitrary"),
            vmem_limit_bytes=vmem_limit),
    )(pred_cn, target2d)

    total = jnp.sum(sums[:, 0, 0])
    n_valid = jnp.sum(sums[:, 1, 0])
    denom = jnp.maximum(n_valid * c, 1.0)
    mean_loss = jnp.where(n_valid > 0, total / denom, 0.0)
    return jnp.float32(loss_weight) * mean_loss


def _focal_loss_ref(pred, target, *, gamma=2.0, alpha=0.5, loss_weight=1.0,
                    ignore_index=-1):
    """Pure-JAX reference mirroring the PyTorch forward (mean reduction)."""
    valid = target != ignore_index
    c = pred.shape[1]
    t = jax.nn.one_hot(jnp.where(valid, target, 0), c, dtype=jnp.float32)
    x = pred.astype(jnp.float32)
    p = jax.nn.sigmoid(x)
    one_minus_pt = (1 - p) * t + p * (1 - t)
    fw = (alpha * t + (1 - alpha) * (1 - t)) * one_minus_pt ** gamma
    bce = jnp.maximum(x, 0) - x * t + jnp.log1p(jnp.exp(-jnp.abs(x)))
    loss = bce * fw
    loss = jnp.where(valid[:, None], loss, 0.0)
    n_valid = jnp.sum(valid)
    return jnp.where(n_valid > 0,
                     loss_weight * jnp.sum(loss) / (n_valid * c), 0.0)


if __name__ == "__main__":
    key = jax.random.PRNGKey(0)
    k1, k2, k3, k4 = jax.random.split(key, 4)

    # Test 1: default (N, C) path, single ragged tile.
    N, C = 200, 13
    pred = jax.random.normal(k1, (N, C), dtype=jnp.float32)
    # targets in [-1, C): -1 = ignore_index (some rows get masked out)
    target = jax.random.randint(k2, (N,), -1, C, dtype=jnp.int32)

    out = focal_loss(pred, target, gamma=2.0, alpha=0.5, loss_weight=1.0,
                     ignore_index=-1)
    out = jax.block_until_ready(out)
    ref = _focal_loss_ref(pred, target, gamma=2.0, alpha=0.5, loss_weight=1.0,
                          ignore_index=-1)
    # approx reciprocal changes the result at ~1e-3 relative level.
    assert jnp.allclose(out, ref, rtol=5e-3, atol=1e-6), (out, ref)

    # Test 2: pre-transposed (C, N) input (no wrapper transpose), multi-block
    # grid, 2-way split with a clamped duplicate tail block.
    N2, C2 = 1200, 13
    pred2 = jax.random.normal(k3, (N2, C2), dtype=jnp.float32)
    target2 = jax.random.randint(k4, (N2,), -1, C2, dtype=jnp.int32)

    out2 = focal_loss(jnp.transpose(pred2), target2, pred_transposed=True,
                      tile_n=512, num_splits=2)
    out2 = jax.block_until_ready(out2)
    ref2 = _focal_loss_ref(pred2, target2)
    assert jnp.allclose(out2, ref2, rtol=5e-3, atol=1e-6), (out2, ref2)

    print("KERNEL_OK")
</pallas_src>

<mosaic_0001>
module attributes {stable_mosaic.version = 11 : i64} {
  func.func @_focal_loss_kernel(%arg0: i32, %arg1: i32, %arg2: memref<13x256xf32, #tpu.memory_space<vmem>>, %arg3: memref<1x256xi32, #tpu.memory_space<vmem>>, %arg4: memref<1x2x128xf32, #tpu.memory_space<vmem>>, %arg5: memref<1x128xf32, #tpu.memory_space<vmem>>, %arg6: memref<1x128xf32, #tpu.memory_space<vmem>>) attributes {dimension_semantics = [#tpu.dimension_semantics<parallel>, #tpu.dimension_semantics<arbitrary>], iteration_bounds = array<i64: 1, 1>, scalar_prefetch = 0 : i64, scratch_operands = 2 : i64, tpu.core_type = #tpu.core_type<tc>, window_params = [{transform_indices = @transform_0, window_bounds = array<i64: 13, 256>}, {transform_indices = @transform_1, window_bounds = array<i64: 1, 256>}, {transform_indices = @transform_2, window_bounds = array<i64: 1, 2, 128>}]} {
    %c0_i32 = arith.constant 0 : i32
    %0 = arith.cmpi eq, %arg1, %c0_i32 : i32
    %1 = arith.extui %0 : i1 to i32
    %c0_i32_0 = arith.constant 0 : i32
    %2 = arith.cmpi ne, %1, %c0_i32_0 : i32
    scf.if %2 {
      %cst_25 = arith.constant 0.000000e+00 : f32
      %70 = vector.broadcast %cst_25 : f32 to vector<1x128xf32>
      %c0_26 = arith.constant 0 : index
      %c0_27 = arith.constant 0 : index
      %71 = vector.load %arg5[%c0_26, %c0_27] : memref<1x128xf32, #tpu.memory_space<vmem>>, vector<1x128xf32>
      tpu.vector_store %arg5[%c0_26, %c0_27], %70 {strides = array<i32>} : memref<1x128xf32, #tpu.memory_space<vmem>>, vector<1x128xf32>,
      %cst_28 = arith.constant 0.000000e+00 : f32
      %72 = vector.broadcast %cst_28 : f32 to vector<1x128xf32>
      %c0_29 = arith.constant 0 : index
      %c0_30 = arith.constant 0 : index
      %73 = vector.load %arg6[%c0_29, %c0_30] : memref<1x128xf32, #tpu.memory_space<vmem>>, vector<1x128xf32>
      tpu.vector_store %arg6[%c0_29, %c0_30], %72 {strides = array<i32>} : memref<1x128xf32, #tpu.memory_space<vmem>>, vector<1x128xf32>,
    } else {
    }
    %c0 = arith.constant 0 : index
    %c0_1 = arith.constant 0 : index
    %3 = vector.load %arg2[%c0, %c0_1] : memref<13x256xf32, #tpu.memory_space<vmem>>, vector<13x256xf32>
    %c0_2 = arith.constant 0 : index
    %c0_3 = arith.constant 0 : index
    %4 = vector.load %arg3[%c0_2, %c0_3] : memref<1x256xi32, #tpu.memory_space<vmem>>, vector<1x256xi32>
    %c1_i32 = arith.constant 1 : i32
    %5 = arith.muli %arg0, %c1_i32 : i32
    %6 = arith.addi %5, %arg1 : i32
    %c256_i32 = arith.constant 256 : i32
    %7 = arith.muli %6, %c256_i32 : i32
    %8 = tpu.iota {dimensions = array<i32: 1>} : vector<1x256xi32>
    %9 = vector.broadcast %7 : i32 to vector<1x256xi32>
    %10 = arith.addi %9, %8 : vector<1x256xi32>
    %c200_i32 = arith.constant 200 : i32
    %11 = vector.broadcast %c200_i32 : i32 to vector<1x256xi32>
    %12 = arith.cmpi slt, %10, %11 : vector<1x256xi32>
    %c-1_i32 = arith.constant -1 : i32
    %13 = vector.broadcast %c-1_i32 : i32 to vector<1x256xi32>
    %14 = arith.cmpi ne, %4, %13 : vector<1x256xi32>
    %15 = arith.andi %12, %14 : vector<1x256xi1>
    %16 = tpu.iota {dimensions = array<i32: 0>} : vector<13x256xi32>
    %17 = vector.broadcast %4 : vector<1x256xi32> to vector<13x256xi32>
    %18 = arith.cmpi eq, %16, %17 : vector<13x256xi32>
    %cst = arith.constant -1.000000e+00 : f32
    %cst_4 = arith.constant 1.000000e+00 : f32
    %19 = vector.broadcast %cst : f32 to vector<13x256xf32>
    %20 = vector.broadcast %cst_4 : f32 to vector<13x256xf32>
    %21 = arith.select %18, %19, %20 : vector<13x256xi1>, vector<13x256xf32>
    %cst_5 = arith.constant 5.000000e-01 : f32
    %cst_6 = arith.constant 5.000000e-01 : f32
    %22 = vector.broadcast %cst_5 : f32 to vector<13x256xf32>
    %23 = vector.broadcast %cst_6 : f32 to vector<13x256xf32>
    %24 = arith.select %18, %22, %23 : vector<13x256xi1>, vector<13x256xf32>
    %25 = arith.mulf %3, %21 : vector<13x256xf32>
    %26 = math.absf %25 : vector<13x256xf32>
    %cst_7 = arith.constant 0.000000e+00 : f32
    %27 = vector.broadcast %cst_7 : f32 to vector<13x256xf32>
    %28 = arith.subf %27, %26 : vector<13x256xf32>
    %29 = math.exp %28 : vector<13x256xf32>
    %cst_8 = arith.constant 1.000000e+00 : f32
    %30 = vector.broadcast %cst_8 : f32 to vector<13x256xf32>
    %31 = arith.addf %30, %29 : vector<13x256xf32>
    %32 = tpu.reciprocal %31 {approx = true} : vector<13x256xf32> -> vector<13x256xf32>
    %cst_9 = arith.constant 0.000000e+00 : f32
    %33 = vector.broadcast %cst_9 : f32 to vector<13x256xf32>
    %34 = arith.cmpf oge, %25, %33 : vector<13x256xf32>
    %cst_10 = arith.constant 1.000000e+00 : f32
    %35 = vector.broadcast %cst_10 : f32 to vector<13x256xf32>
    %36 = arith.select %34, %35, %29 : vector<13x256xi1>, vector<13x256xf32>
    %37 = arith.mulf %36, %32 : vector<13x256xf32>
    %cst_11 = arith.constant 0.000000e+00 : f32
    %38 = vector.broadcast %cst_11 : f32 to vector<13x256xf32>
    %39 = arith.maximumf %25, %38 : vector<13x256xf32>
    %40 = math.log1p %29 : vector<13x256xf32>
    %41 = arith.addf %39, %40 : vector<13x256xf32>
    %42 = arith.mulf %41, %24 : vector<13x256xf32>
    %43 = arith.mulf %37, %37 : vector<13x256xf32>
    %44 = arith.mulf %42, %43 : vector<13x256xf32>
    %cst_12 = arith.constant 0.000000e+00 : f32
    %45 = vector.shape_cast %15 : vector<1x256xi1> to vector<1x256xi1>
    %46 = vector.broadcast %45 : vector<1x256xi1> to vector<13x256xi1>
    %47 = vector.broadcast %cst_12 : f32 to vector<13x256xf32>
    %48 = arith.select %46, %44, %47 : vector<13x256xi1>, vector<13x256xf32>
    %c0_13 = arith.constant 0 : index
    %c0_14 = arith.constant 0 : index
    %49 = vector.load %arg5[%c0_13, %c0_14] : memref<1x128xf32, #tpu.memory_space<vmem>>, vector<1x128xf32>
    %50 = vector.shape_cast %48 : vector<13x256xf32> to vector<1x13x256xf32>
    %cst_15 = arith.constant dense<0.000000e+00> : vector<1xf32>
    %51 = vector.multi_reduction <add>, %50, %cst_15 [1, 2] : vector<1x13x256xf32> to vector<1xf32>
    %52 = vector.shape_cast %51 : vector<1xf32> to vector<1x1x1xf32>
    %53 = vector.extract %52[0, 0, 0] : f32 from vector<1x1x1xf32>
    %54 = vector.broadcast %53 : f32 to vector<1x128xf32>
    %55 = arith.addf %49, %54 : vector<1x128xf32>
    %c0_16 = arith.constant 0 : index
    %c0_17 = arith.constant 0 : index
    %56 = vector.load %arg5[%c0_16, %c0_17] : memref<1x128xf32, #tpu.memory_space<vmem>>, vector<1x128xf32>
    tpu.vector_store %arg5[%c0_16, %c0_17], %55 {strides = array<i32>} : memref<1x128xf32, #tpu.memory_space<vmem>>, vector<1x128xf32>,
    %c0_18 = arith.constant 0 : index
    %c0_19 = arith.constant 0 : index
    %57 = vector.load %arg6[%c0_18, %c0_19] : memref<1x128xf32, #tpu.memory_space<vmem>>, vector<1x128xf32>
    %58 = arith.extui %15 : vector<1x256xi1> to vector<1x256xi32>
    %59 = arith.sitofp %58 : vector<1x256xi32> to vector<1x256xf32>
    %60 = vector.shape_cast %59 : vector<1x256xf32> to vector<1x1x256xf32>
    %cst_20 = arith.constant dense<0.000000e+00> : vector<1xf32>
    %61 = vector.multi_reduction <add>, %60, %cst_20 [1, 2] : vector<1x1x256xf32> to vector<1xf32>
    %62 = vector.shape_cast %61 : vector<1xf32> to vector<1x1x1xf32>
    %63 = vector.extract %62[0, 0, 0] : f32 from vector<1x1x1xf32>
    %64 = vector.broadcast %63 : f32 to vector<1x128xf32>
    %65 = arith.addf %57, %64 : vector<1x128xf32>
    %c0_21 = arith.constant 0 : index
    %c0_22 = arith.constant 0 : index
    %66 = vector.load %arg6[%c0_21, %c0_22] : memref<1x128xf32, #tpu.memory_space<vmem>>, vector<1x128xf32>
    tpu.vector_store %arg6[%c0_21, %c0_22], %65 {strides = array<i32>} : memref<1x128xf32, #tpu.memory_space<vmem>>, vector<1x128xf32>,
    %c0_i32_23 = arith.constant 0 : i32
    %67 = arith.cmpi eq, %arg1, %c0_i32_23 : i32
    %68 = arith.extui %67 : i1 to i32
    %c0_i32_24 = arith.constant 0 : i32
    %69 = arith.cmpi ne, %68, %c0_i32_24 : i32
    scf.if %69 {
      %c0_25 = arith.constant 0 : index
      %c0_26 = arith.constant 0 : index
      %70 = vector.load %arg5[%c0_25, %c0_26] : memref<1x128xf32, #tpu.memory_space<vmem>>, vector<1x128xf32>
      %c0_27 = arith.constant 0 : index
      %c0_28 = arith.constant 0 : index
      %c0_29 = arith.constant 0 : index
      %71 = vector.load %arg4[%c0_27, %c0_28, %c0_29] : memref<1x2x128xf32, #tpu.memory_space<vmem>>, vector<1x1x128xf32>
      %72 = vector.shape_cast %71 : vector<1x1x128xf32> to vector<1x128xf32>
      %73 = vector.shape_cast %70 : vector<1x128xf32> to vector<1x1x128xf32>
      tpu.vector_store %arg4[%c0_27, %c0_28, %c0_29], %73 {strides = array<i32>} : memref<1x2x128xf32, #tpu.memory_space<vmem>>, vector<1x1x128xf32>,
      %c0_30 = arith.constant 0 : index
      %c0_31 = arith.constant 0 : index
      %74 = vector.load %arg6[%c0_30, %c0_31] : memref<1x128xf32, #tpu.memory_space<vmem>>, vector<1x128xf32>
      %c0_32 = arith.constant 0 : index
      %c1 = arith.constant 1 : index
      %c0_33 = arith.constant 0 : index
      %75 = vector.load %arg4[%c0_32, %c1, %c0_33] : memref<1x2x128xf32, #tpu.memory_space<vmem>>, vector<1x1x128xf32>
      %76 = vector.shape_cast %75 : vector<1x1x128xf32> to vector<1x128xf32>
      %77 = vector.shape_cast %74 : vector<1x128xf32> to vector<1x1x128xf32>
      tpu.vector_store %arg4[%c0_32, %c1, %c0_33], %77 {strides = array<i32>} : memref<1x2x128xf32, #tpu.memory_space<vmem>>, vector<1x1x128xf32>,
    } else {
    }
    return
  }
  func.func @transform_0(%arg0: i32, %arg1: i32) -> (i32, i32) {
    %c1_i32 = arith.constant 1 : i32
    %0 = arith.muli %arg0, %c1_i32 : i32
    %1 = arith.addi %0, %arg1 : i32
    %c0_i32 = arith.constant 0 : i32
    %2 = arith.minsi %1, %c0_i32 : i32
    %c0_i32_0 = arith.constant 0 : i32
    %c0_i32_1 = arith.constant 0 : i32
    return %c0_i32_0, %2 : i32, i32
  }
  func.func @transform_1(%arg0: i32, %arg1: i32) -> (i32, i32) {
    %c1_i32 = arith.constant 1 : i32
    %0 = arith.muli %arg0, %c1_i32 : i32
    %1 = arith.addi %0, %arg1 : i32
    %c0_i32 = arith.constant 0 : i32
    %2 = arith.minsi %1, %c0_i32 : i32
    %c0_i32_0 = arith.constant 0 : i32
    %c0_i32_1 = arith.constant 0 : i32
    return %c0_i32_0, %2 : i32, i32
  }
  func.func @transform_2(%arg0: i32, %arg1: i32) -> (i32, i32, i32) {
    %c0_i32 = arith.constant 0 : i32
    %c0_i32_0 = arith.constant 0 : i32
    %c0_i32_1 = arith.constant 0 : i32
    return %arg0, %c0_i32, %c0_i32_0 : i32, i32, i32
  }
}

</mosaic_0001>

<bundles_post_ra>
// kernel: tpu_custom_call.1
= control target key start
LH: loop header
LB: loop body
LE: loop exit
PB: predicated region body
PF: predicated region fallthrough
CT: control target
= control target key end

     0   :  { %7 = vsyncpa [#allocation5], 0  ;;  %s521_s0 = inlined_call_operand.hbm [shape: f32[13,200], index: 0, kind: input, shape index: {}]   ;;  %s522_s1 = inlined_call_operand.vmem [shape: s32[1,200], index: 1, kind: input, shape index: {}]   ;;  %s523_s2 = inlined_call_operand.hbm [shape: f32[1,2,128], index: 2, kind: output, shape index: {}]  }
   0x1   :  { %8 = vsyncpa [#allocation6], 0  ;;  %s381_s9 = smov [#allocation4]   ;;  %s333_s13 = scalar_lea.hbm %s521_s0, 512 }
   0x2   :  { %s20_s10 = sshll.u32 %s381_s9, 4  ;;  %p334_p0 = scmp.ne.s32.totalorder %s521_s0, %s333_s13  ;;  %s21_s10 = int_to_ptr.vmem [resolvable:$true] %s20_s10 }
   0x3   :  { %p337_p1 = scmp.lt.u32.totalorder %s333_s13, %s521_s0 }
   0x5   :  { %p339_p2 = pnand %p337_p1, %p334_p0 }
   0x7   :  { %342 = shalt.err (!%p339_p2)
}
   0x8   :  { %s343_s18 = scalar_lea.vmem %s21_s10, 512  ;;  %p348_p4 = scmp.lt.s32.totalorder %s21_s10, %s21_s10 }
   0x9   :  { %p344_p3 = scmp.ne.s32.totalorder %s21_s10, %s343_s18  ;;  %p349_p5 = scmp.lt.s32.totalorder %s343_s18, %s343_s18 }
   0xb   :  { %p350_p6 = por %p349_p5, %p348_p4 }
   0xd   :  { %p351_p7 = pnand %p350_p6, %p344_p3 }
   0xf   :  { %354 = shalt.err (!%p351_p7)
}
  0x10   :  { %s382_s19 = smov 256   ;;  %s383_s20 = smov 16  }
  0x11   :  { %26 = dma.hbm_to_vmem [thread:$0]  %s521_s0, 512, %s21_s10, [#allocation5], %s382_s19, %s382_s19, %s383_s20  }
  0x12   :  { %377 = dma.done.wait [#allocation5], 512  }
  0x13   :  { %378 = vsyncadd [#allocation5], 4294966784  ;;  %v78_v0 = vlaneseq  ;;  %v384_v2 = vmov 0.0   ;;  %v75_v5 = vld [vmem:[%s522_s1] sm:$0x3]  ;;  %v71_v9 = vld [vmem:[#allocation4] sm:$0xff] }
  0x14   :  { %69 = vst [vmem:[#allocation2] sm:$0x1] %v384_v2  ;;  %70 = vst [vmem:[#allocation3] sm:$0x1] %v384_v2  ;;  %v72_v10 = vld [vmem:[#allocation4 + $0x8] sm:$0xff]  ;;  %v385_v13 = vmov 1.0  }
  0x15   :  { %v89_v1 = vshrl.u32 %v78_v0, 7  ;;  %v73_v11 = vld [vmem:[#allocation4 + $0x10] sm:$0x1f]  ;;  %v74_v12 = vld [vmem:[#allocation4 + $0x18] sm:$0x1f]  ;;  %vm86_vm4 = vcmp.ne.s32.totalorder %v75_v5, 4294967295 }
  0x16   :  { %v79_v34 = vand.u32 127, %v78_v0  ;;  %v386_v35 = vmov 0   ;;  %s387_s25 = smov [#allocation7]  }
  0x17   :  { %v417_v3 = vsub.s32 0, %v89_v1  ;;  %v94_v4 = vsub.s32 1, %v89_v1  ;;  %v102_v6 = vadd.s32 8, %v89_v1  ;;  %v87_v36 = vsel %vm86_vm4, 1, %v386_v35  ;;  %s282_s26 = sshll.u32 %s387_s25, 4  ;;  %s283_s26 = int_to_ptr.vmem [resolvable:$true] %s282_s26 }
  0x18   :  { %v80_v39 = vadd.s32 128, %v79_v34  ;;  %vm253_vm4 = vcmask 1040384   ;;  %s355_s27 = scalar_lea.vmem %s283_s26, 32  ;;  %p360_p9 = scmp.lt.s32.totalorder %s283_s26, %s283_s26 }
  0x19   :  { %v106_v7 = vrot.slane %v75_v5, %v417_v3  ;;  %v110_v8 = vrot.slane %v75_v5, %v94_v4  ;;  %v91_v40 = vrot.slane %v87_v36, %v417_v3  ;;  %v95_v41 = vrot.slane %v87_v36, %v94_v4  ;;  %p356_p8 = scmp.ne.s32.totalorder %s283_s26, %s355_s27  ;;  %p361_p10 = scmp.lt.s32.totalorder %s355_s27, %s355_s27 }
  0x1a   :  { %vm85_vm5 = vcmp.lt.s32.totalorder %v80_v39, 200 }
  0x1b   :  { %vm111_vm0 = vcmp.eq.s32.totalorder %v89_v1, %v106_v7  ;;  %vm112_vm1 = vcmp.eq.s32.totalorder %v89_v1, %v110_v8  ;;  %vm113_vm2 = vcmp.eq.s32.totalorder %v102_v6, %v106_v7  ;;  %vm114_vm3 = vcmp.eq.s32.totalorder %v102_v6, %v110_v8  ;;  %p362_p11 = por %p361_p10, %p360_p9 }
  0x1c   :  { %v115_v14 = vsel %vm111_vm0, -1.0, %v385_v13  ;;  %v116_v15 = vsel %vm112_vm1, -1.0, %v385_v13  ;;  %v117_v16 = vsel %vm113_vm2, -1.0, %v385_v13  ;;  %v118_v17 = vsel %vm114_vm3, -1.0, %v385_v13 }
  0x1d   :  { %v423_v18 = vmul.f32 %v115_v14, %v71_v9  ;;  %v425_v19 = vmul.f32 %v116_v15, %v72_v10  ;;  %v427_v20 = vmul.f32 %v117_v16, %v73_v11  ;;  %v429_v21 = vmul.f32 %v118_v17, %v74_v12  ;;  %p363_p12 = pnand %p362_p11, %p356_p8 }
  0x1e   :  { %vm439_vm6 = vcmp.ne.s32.totalorder %v91_v40, 0  ;;  %vm97_vm7 = vcmp.ne.s32.totalorder %v95_v41, 0  ;;  %vm233_vm3 = vcmask 1044480  }
  0x1f   :  { %v123_v22 = vand.u32 2147483647, %v423_v18  ;;  %v124_v23 = vand.u32 2147483647, %v425_v19  ;;  %v125_v24 = vand.u32 2147483647, %v427_v20  ;;  %vm443_vm8 = vmand %vm85_vm5, %vm97_vm7 }
  0x20   :  { %v126_v25 = vand.u32 2147483647, %v429_v21  ;;  %v449_v51 = vsel %vm439_vm6, 1, %v386_v35  ;;  %vm147_vm9 = vcmp.ge.f32.partialorder %v423_v18, 0.0  ;;  %v455_v55 = vsel %vm443_vm8, 1, %v386_v35 }
  0x21   :  { %v127_v26 = vsub.f32 0.0, %v123_v22  ;;  %v128_v27 = vsub.f32 0.0, %v124_v23  ;;  %v129_v28 = vsub.f32 0.0, %v125_v24  ;;  %v220_v56 = vrot.slane %v449_v51, %v417_v3 }
  0x22   :  { %v130_v29 = vsub.f32 0.0, %v126_v25  ;;  %vm148_vm10 = vcmp.ge.f32.partialorder %v425_v19, 0.0  ;;  %vm149_vm11 = vcmp.ge.f32.partialorder %v427_v20, 0.0  ;;  %vm150_vm12 = vcmp.ge.f32.partialorder %v429_v21, 0.0 }
  0x23   :  { %v131_v30 = vmul.f32 1.442695, %v127_v26  ;;  %v133_v31 = vmul.f32 1.442695, %v128_v27  ;;  %v135_v32 = vmul.f32 1.442695, %v129_v28  ;;  %v224_v10 = vrot.slane %v455_v55, %v417_v3 }
  0x24   :  { %v137_v33 = vmul.f32 1.442695, %v130_v29  ;;  %v159_v59 = vmax.f32 %v423_v18, 0.0  ;;  %v160_v60 = vmax.f32 %v425_v19, 0.0  ;;  %v161_v1 = vmax.f32 %v427_v20, 0.0 }
  0x25   :  { %309 = vpow2.f32 %v131_v30  ;;  %v162_v13 = vmax.f32 %v429_v21, 0.0  ;;  %vm487_vm1 = vcmp.eq.s32.totalorder %v220_v56, 1  ;;  %vm491_vm2 = vcmp.eq.s32.totalorder %v224_v10, 1 }
  0x26   :  { %311 = vpow2.f32 %v133_v31 }
  0x27   :  { %313 = vpow2.f32 %v135_v32 }
  0x28   :  { %315 = vpow2.f32 %v137_v33 }
  0x2f   :  { %v310_v37 = vpop.eup %309 }
  0x30   :  { %v312_v38 = vpop.eup %311  ;;  %v139_v42 = vadd.f32 1.0, %v310_v37  ;;  %v166_v50 = vmul.f32 -0.5, %v310_v37  ;;  %v169_v61 = vand.u32 2147483647, %v310_v37  ;;  %v151_v0 = vsel %vm147_vm9, 1.0, %v310_v37 }
  0x31   :  { %v314_v43 = vpop.eup %313  ;;  %v140_v44 = vadd.f32 1.0, %v312_v38  ;;  %v175_v52 = vmul.f32 -0.5, %v312_v38  ;;  %v178_v4 = vand.u32 2147483647, %v312_v38  ;;  %v152_v7 = vsel %vm148_vm10, 1.0, %v312_v38 }
  0x32   :  { %v436_v45 = vpop.eup %315  ;;  %v141_v46 = vadd.f32 1.0, %v314_v43  ;;  %317 = vrcp.f32 %v139_v42  ;;  %v184_v53 = vmul.f32 -0.5, %v314_v43  ;;  %v167_v57 = vadd.f32 1.0, %v166_v50 }
  0x33   :  { %v142_v47 = vadd.f32 1.0, %v436_v45  ;;  %319 = vrcp.f32 %v140_v44  ;;  %v193_v54 = vmul.f32 -0.5, %v436_v45  ;;  %v176_v62 = vadd.f32 1.0, %v175_v52 }
  0x34   :  { %321 = vrcp.f32 %v141_v46  ;;  %v185_v5 = vadd.f32 1.0, %v184_v53  ;;  %v187_v8 = vand.u32 2147483647, %v314_v43  ;;  %v153_v12 = vsel %vm149_vm11, 1.0, %v314_v43 }
  0x35   :  { %323 = vrcp.f32 %v142_v47  ;;  %v194_v9 = vadd.f32 1.0, %v193_v54  ;;  %v168_v14 = vmul.f32 %v310_v37, %v167_v57  ;;  %v196_v15 = vand.u32 2147483647, %v436_v45 }
  0x36   :  { %325 = vlog2.f32 %v139_v42  ;;  %v154_v17 = vsel %vm150_vm12, 1.0, %v436_v45  ;;  %vm474_vm13 = vcmp.lt.f32.partialorder %v169_v61, 0.0004427343  ;;  %v177_v3 = vmul.f32 %v312_v38, %v176_v62 }
  0x37   :  { %327 = vlog2.f32 %v140_v44  ;;  %vm478_vm14 = vcmp.lt.f32.partialorder %v178_v4, 0.0004427343  ;;  %v186_v25 = vmul.f32 %v314_v43, %v185_v5  ;;  %vm188_vm15 = vcmp.lt.f32.partialorder %v187_v8, 0.0004427343 }
  0x38   :  { %329 = vlog2.f32 %v141_v46  ;;  %v195_v21 = vmul.f32 %v436_v45, %v194_v9  ;;  %vm197_vm0 = vcmp.lt.f32.partialorder %v196_v15, 0.0004427343  ;;  %v296_v61 = vsel %vm439_vm6, 1.0, %v384_v2 }
  0x39   :  { %331 = vlog2.f32 %v142_v47  ;;  %v297_v62 = vsel %vm443_vm8, 1.0, %v384_v2  ;;  %v254_v5 = vsel %vm253_vm4, %v296_v61, 0.0 }
  0x3c   :  { %v318_v58 = vpop.eup %317 }
  0x3d   :  { %v320_v63 = vpop.eup %319  ;;  %v155_v18 = vmul.f32 %v318_v58, %v151_v0 }
  0x3e   :  { %v322_v6 = vpop.eup %321  ;;  %v156_v23 = vmul.f32 %v320_v63, %v152_v7 }
  0x3f   :  { %v324_v11 = vpop.eup %323  ;;  %v157_v27 = vmul.f32 %v322_v6, %v153_v12  ;;  %v207_v36 = vmul.f32 %v155_v18, %v155_v18  ;;  %v255_v6 = vsel %vm253_vm4, %v297_v62, 0.0 }
  0x40   :  { %v326_v16 = vpop.eup %325  ;;  %v158_v30 = vmul.f32 %v324_v11, %v154_v17  ;;  %v208_v39 = vmul.f32 %v156_v23, %v156_v23  ;;  %v256_v8 = vadd.f32 %v255_v6, %v254_v5 }
  0x41   :  { %v328_v22 = vpop.eup %327  ;;  %v165_v20 = vmul.f32 0.6931472, %v326_v16  ;;  %v209_v43 = vmul.f32 %v157_v27, %v157_v27 }
  0x42   :  { %v330_v26 = vpop.eup %329  ;;  %v174_v28 = vmul.f32 0.6931472, %v328_v22  ;;  %v210_v46 = vmul.f32 %v158_v30, %v158_v30 }
  0x43   :  { %v332_v29 = vpop.eup %331  ;;  %v171_v31 = vsel %vm474_vm13, %v168_v14, %v165_v20  ;;  %v183_v32 = vmul.f32 0.6931472, %v330_v26  ;;  %v250_v20 = vld [vmem:[#allocation3] sm:$0x1] }
  0x44   :  { %v180_v33 = vsel %vm478_vm14, %v177_v3, %v174_v28  ;;  %v192_v34 = vmul.f32 0.6931472, %v332_v29  ;;  %v199_v35 = vadd.f32 %v171_v31, %v159_v59  ;;  %v231_v3 = vld [vmem:[#allocation2] sm:$0x1] }
  0x45   :  { %v189_v37 = vsel %vm188_vm15, %v186_v25, %v183_v32  ;;  %v200_v38 = vadd.f32 %v180_v33, %v160_v60 }
  0x46   :  { %v198_v40 = vsel %vm197_vm0, %v195_v21, %v192_v34  ;;  %v201_v41 = vadd.f32 %v189_v37, %v161_v1  ;;  %v203_v42 = vmul.f32 0.5, %v199_v35 }
  0x47   :  { %v202_v44 = vadd.f32 %v198_v40, %v162_v13  ;;  %v204_v45 = vmul.f32 0.5, %v200_v38 }
  0x48   :  { %v205_v50 = vmul.f32 0.5, %v201_v41  ;;  %v211_v51 = vmul.f32 %v207_v36, %v203_v42 }
  0x49   :  { %v206_v53 = vmul.f32 0.5, %v202_v44  ;;  %v212_v54 = vmul.f32 %v208_v39, %v204_v45 }
  0x4a   :  { %v213_v55 = vmul.f32 %v209_v43, %v205_v50  ;;  %v227_v57 = vsel %vm487_vm1, %v211_v51, 0.0 }
  0x4b   :  { %v214_v58 = vmul.f32 %v210_v46, %v206_v53  ;;  %v228_v56 = vsel %vm491_vm2, %v212_v54, 0.0 }
  0x4c   :  { %v229_v59 = vsel %vm487_vm1, %v213_v55, 0.0  ;;  %v232_v60 = vadd.f32 %v228_v56, %v227_v57 }
  0x4d   :  { %v230_v63 = vsel %vm491_vm2, %v214_v58, 0.0  ;;  %v234_v0 = vsel %vm233_vm3, %v229_v59, 0.0 }
  0x4e   :  { %v235_v1 = vadd.f32 %v234_v0, %v232_v60  ;;  %v236_v4 = vsel %vm233_vm3, %v230_v63, 0.0 }
  0x50   :  { %v237_v7 = vadd.f32 %v236_v4, %v235_v1 }
  0x52   :  { %238 = vadd.xlane.f32.xlu0 %v237_v7 }
  0x56   :  { %257 = vadd.xlane.f32.xlu0 %v256_v8 }
  0xdf   :  { %v239_v9 = vpop.xlane.xlu0 %238 }
  0xe0   :  { %v240_v10 = vrot.slane %v239_v9, 4 }
  0xe2   :  { %v241_v48 = vadd.f32 %v240_v10, %v239_v9 }
  0xe3   :  { %v258_v11 = vpop.xlane.xlu0 %257 }
  0xe4   :  { %v242_v12 = vrot.slane %v241_v48, 2  ;;  %v259_v13 = vrot.slane %v258_v11, 4 }
  0xe6   :  { %v260_v49 = vadd.f32 %v259_v13, %v258_v11  ;;  %v243_v2 = vadd.f32 %v242_v12, %v241_v48 }
  0xe8   :  { %v261_v14 = vrot.slane %v260_v49, 2  ;;  %v244_v15 = vrot.slane %v243_v2, 1 }
  0xea   :  { %v262_v16 = vadd.f32 %v261_v14, %v260_v49  ;;  %v245_v17 = vadd.f32 %v244_v15, %v243_v2 }
  0xec   :  { %298 = vpush %v245_v17  ;;  %v263_v18 = vrot.slane %v262_v16, 1 }
  0xee   :  { %v264_v19 = vadd.f32 %v263_v18, %v262_v16 }
  0xf0   :  { %300 = vpush %v264_v19 }
 0x11d   :  { %s299_s0 = spop %298 }
 0x11e   :  { %v247_v22 = vstv %s299_s0 }
 0x11f   :  { %v248_v23 = vadd.f32 %v247_v22, %v231_v3 }
 0x121   :  { %249 = vst [vmem:[#allocation2] sm:$0x1] %v248_v23  ;;  %s301_s1 = spop %300 }
 0x122   :  { %v266_v24 = vstv %s301_s1 }
 0x123   :  { %v267_v25 = vadd.f32 %v266_v24, %v250_v20 }
 0x125   :  { %268 = vst [vmem:[#allocation3] sm:$0x1] %v267_v25 }
 0x128   :  { %v272_v26 = vld [vmem:[#allocation2] sm:$0x1] }
 0x129   :  { %273 = vst [vmem:[#allocation7] sm:$0x1] %v272_v26 }
 0x12c   :  { %v274_v27 = vld [vmem:[#allocation3] sm:$0x1] }
 0x12d   :  { %275 = vst [vmem:[#allocation7 + $0x1] sm:$0x1] %v274_v27 }
 0x12e   :  { %366 = shalt.err (!%p363_p12)
}
 0x12f   :  { %s367_s30 = scalar_lea.hbm %s523_s2, 32 }
 0x130   :  { %p368_p13 = scmp.ne.s32.totalorder %s523_s2, %s367_s30  ;;  %p371_p0 = scmp.lt.u32.totalorder %s367_s30, %s523_s2 }
 0x132   :  { %p373_p1 = pnand %p371_p0, %p368_p13 }
 0x134   :  { %376 = shalt.err (!%p373_p1)
}
 0x135   :  { %285 = dma.vmem_to_hbm [thread:$0]  %s283_s26, 32, %s523_s2, [#allocation6]  }
 0x136   :  { %379 = dma.done.wait [#allocation6], 32  }
 0x137   :  { %380 = vsyncadd [#allocation6], 4294967264 }
 0x138   :  { %289 = vsyncpa [#allocation5], 1 }
 0x139   :  { %290 = vsyncpa [#allocation6], 1 }

</bundles_post_ra>
